<compile_context>
chip_gen: v5e
topology: v5e:2x2
jax: 0.10.0
libtpu: 0.0.40
codegen_flags: <defaults>
</compile_context>

<pallas_src>
import jax
import jax.numpy as jnp
from jax.experimental import pallas as pl
from jax.experimental.pallas import tpu as pltpu


_N_STATS = 16   # 9 used, padded to a sublane multiple
# row layout of the per-core partial block (per-column raw sums):
#   0 pixel_l1   1 violation   2 degree_sq   3 mask_count   4 sun_pol
#   5 magnetic   6 poisson     7 grad_x      8 grad_y


def _num_tensorcores():
    """Best-effort TensorCore count (v7x: 2).  Falls back to 1 (always safe)."""
    try:
        info = pltpu.get_tpu_info()
        for name in ("num_cores", "core_count", "num_tensorcores",
                     "cores_per_chip", "tensorcore_count"):
            n = getattr(info, name, None)
            if isinstance(n, int) and n >= 1:
                return n
    except Exception:
        pass
    return 1


def _vmem_limit_bytes():
    """Generation-aware VMEM ceiling: ~48 MiB on v7x (64 MiB physical),
    96 MiB on v5e/v6e (128 MiB physical), 32 MiB if the query fails."""
    try:
        cap = int(pltpu.get_tpu_info().vmem_capacity_bytes)
        return max(32 * 1024 * 1024, min((cap * 3) // 4, 96 * 1024 * 1024))
    except Exception:
        return 32 * 1024 * 1024


def _stokes_loss_kernel(pred_ref, target_ref, out_ref):
    b = pl.program_id(1)   # within-core batch reduction step ("arbitrary" axis)

    # ---- single load of this batch element's block, upcast in-register ------
    pred = pred_ref[0].astype(jnp.float32)      # (4, H, W)
    target = target_ref[0].astype(jnp.float32)  # (4, H, W)
    _, H, W = pred.shape

    eps = jnp.float32(1e-3)
    thr = jnp.float32(1e-3)
    zero = jnp.zeros((H, W), jnp.float32)

    # ---- hoisted edge masks (shared by both box5 calls and the gradients) ---
    col = jax.lax.broadcasted_iota(jnp.int32, (H, W), 1)
    row = jax.lax.broadcasted_iota(jnp.int32, (H, W), 0)
    col_ge = {d: col >= d for d in (1, 2)}
    col_lt = {d: col < W - d for d in (1, 2)}
    row_ge = {d: row >= d for d in (1, 2)}
    row_lt = {d: row < H - d for d in (1, 2)}

    pred_I, pred_Q, pred_U, pred_V = pred[0], pred[1], pred[2], pred[3]
    tgt_I, tgt_Q, tgt_U, tgt_V = target[0], target[1], target[2], target[3]

    def col_sum(x):
        # (H, W) -> (1, W): sublane partial reduce only; the cross-lane reduce
        # is deferred to the wrapper (review item: drop 9 cross-lane reduces +
        # 9 scalar SMEM RMWs per grid step).
        return jnp.sum(x, axis=0, keepdims=True)

    # ---- pixel L1 (all 4 channels) -------------------------------------------
    r_pixel = col_sum(jnp.sum(jnp.abs(pred - target), axis=0))

    # ---- stokes consistency ---------------------------------------------------
    pred_pol = jnp.sqrt(pred_Q * pred_Q + pred_U * pred_U + pred_V * pred_V)
    tgt_pol = jnp.sqrt(tgt_Q * tgt_Q + tgt_U * tgt_U + tgt_V * tgt_V)

    r_violation = col_sum(jnp.maximum(pred_pol - pred_I, 0.0))

    mask = (pred_I > eps) & (tgt_I > eps)
    # approx reciprocal on the EUP instead of a full f32 divide on the VPU;
    # the subsequent clip(0, 1) + eps make the ~1e-3 relative error negligible.
    pred_deg = jnp.clip(pred_pol * pl.reciprocal(pred_I + eps, approx=True), 0.0, 1.0)
    tgt_deg = jnp.clip(tgt_pol * pl.reciprocal(tgt_I + eps, approx=True), 0.0, 1.0)
    ddeg = pred_deg - tgt_deg
    r_degree_sq = col_sum(jnp.where(mask, ddeg * ddeg, zero))
    r_mask_cnt = col_sum(mask.astype(jnp.float32))

    # ---- sun polarization ------------------------------------------------------
    r_sun_pol = col_sum(jnp.maximum(jnp.abs(pred_Q) - thr, 0.0)
                        + jnp.maximum(jnp.abs(pred_U) - thr, 0.0)
                        + jnp.maximum(jnp.abs(pred_V) - thr, 0.0))

    # ---- magnetic field preservation (0/1 mask -> single multiply) ------------
    mag_mask = (tgt_pol > thr).astype(jnp.float32)
    d_i = pred_I - tgt_I
    r_magnetic = col_sum(mag_mask * d_i * d_i)

    # ---- poisson statistics: 5x5 avg pool, stride 1, zero pad 2, divisor 25 ---
    # Separable shift-and-add stencil: rolls on the XLU, adds on the VPU; zero
    # padding emulated by masking the wrapped lanes / sublanes.
    def box5(x):
        s = x
        for d in (1, 2):
            s = s + jnp.where(col_ge[d], pltpu.roll(x, d, axis=1), zero)
            s = s + jnp.where(col_lt[d], pltpu.roll(x, W - d, axis=1), zero)
        t = s
        for d in (1, 2):
            t = t + jnp.where(row_ge[d], pltpu.roll(s, d, axis=0), zero)
            t = t + jnp.where(row_lt[d], pltpu.roll(s, H - d, axis=0), zero)
        return t * jnp.float32(1.0 / 25.0)

    local_mean = box5(pred_I)
    diff = pred_I - local_mean
    local_var = box5(diff * diff)          # per-pixel own local mean (torch semantics)
    pv = local_var - local_mean
    r_poisson = col_sum(pv * pv)

    # ---- spatial coherence (roll + hoisted edge masks) -------------------------
    right = pltpu.roll(pred_I, W - 1, axis=1)        # right[:, j] = x[:, j+1]
    r_gx = col_sum(jnp.where(col_lt[1], jnp.abs(right - pred_I), zero))
    down = pltpu.roll(pred_I, H - 1, axis=0)         # down[i, :] = x[i+1, :]
    r_gy = col_sum(jnp.where(row_lt[1], jnp.abs(down - pred_I), zero))

    # ---- one vector add into the VMEM-resident per-core output block ----------
    upd = jnp.concatenate(
        [r_pixel, r_violation, r_degree_sq, r_mask_cnt, r_sun_pol,
         r_magnetic, r_poisson, r_gx, r_gy,
         jnp.zeros((_N_STATS - 9, W), jnp.float32)],
        axis=0)                                              # (_N_STATS, W)

    @pl.when(b == 0)
    def _init():
        out_ref[0] = jnp.zeros_like(upd)

    out_ref[0] = out_ref[0] + upd


def stokes_loss(pred, target, discriminator_output=None,
                lambda_pixel=10.0, lambda_stokes=50.0, lambda_polarization=20.0,
                lambda_magnetic=15.0, lambda_poisson=5.0, lambda_spatial=2.0,
                lambda_adv=1.0, cast_inputs_to_bf16=False):
    assert pred.shape == target.shape and pred.shape[1] == 4
    B, C, H, W = pred.shape

    if cast_inputs_to_bf16:
        # Optional: halves HBM->VMEM traffic (big win on HBM-bound v5e).  Off by
        # default to preserve exact f32 forward semantics of the PyTorch module.
        pred = pred.astype(jnp.bfloat16)
        target = target.astype(jnp.bfloat16)

    # Megacore sharding of the batch across TensorCores (v7x: 2, else 1).
    nc = _num_tensorcores()
    if nc < 1 or B % nc != 0:
        nc = 1
    bpc = B // nc

    in_map = lambda c, b: (c * bpc + b, 0, 0, 0)

    itemsize = jnp.dtype(pred.dtype).itemsize
    cost = pl.CostEstimate(
        flops=int(100 * B * H * W),
        transcendentals=int(4 * B * H * W),
        bytes_accessed=int(2 * B * C * H * W * itemsize + nc * _N_STATS * W * 4),
    )

    partials = pl.pallas_call(
        _stokes_loss_kernel,
        out_shape=jax.ShapeDtypeStruct((nc, _N_STATS, W), jnp.float32),
        grid=(nc, bpc),
        in_specs=[
            pl.BlockSpec((1, C, H, W), in_map),
            pl.BlockSpec((1, C, H, W), in_map),
        ],
        # Per-core partial-stat block, resident across the "arbitrary" batch axis.
        out_specs=pl.BlockSpec((1, _N_STATS, W), lambda c, b: (c, 0, 0)),
        compiler_params=pltpu.CompilerParams(
            dimension_semantics=("parallel", "arbitrary"),
            vmem_limit_bytes=_vmem_limit_bytes(),
        ),
        cost_estimate=cost,
    )(pred, target)

    # Final cross-core / cross-lane reduction of the raw sums (done once, in XLA;
    # pairwise summation also improves f32 accumulation vs a serial scalar chain).
    stats = jnp.sum(partials, axis=(0, 2))

    n_all = float(B * C * H * W)
    n_pix = float(B * H * W)

    pixel_loss = stats[0] / n_all
    violation_loss = stats[1] / n_pix
    degree_sq_sum = stats[2]
    mask_count = stats[3]
    sun_pol_loss = stats[4] / n_pix
    magnetic_loss = stats[5] / n_pix
    poisson_loss = stats[6] / n_pix
    spatial_loss = (stats[7] / float(B * H * (W - 1))
                    + stats[8] / float(B * (H - 1) * W))

    degree_loss = jnp.where(mask_count > 0,
                            degree_sq_sum / jnp.maximum(mask_count, 1.0),
                            jnp.float32(0.0))
    stokes_consistency = violation_loss + degree_loss

    total_loss = (lambda_pixel * pixel_loss
                  + lambda_stokes * stokes_consistency
                  + lambda_polarization * sun_pol_loss
                  + lambda_magnetic * magnetic_loss
                  + lambda_poisson * poisson_loss
                  + lambda_spatial * spatial_loss)

    adv_loss = jnp.float32(0.0)
    if discriminator_output is not None:
        adv_loss = -jnp.mean(discriminator_output)
        total_loss = total_loss + lambda_adv * adv_loss

    losses = {
        'pixel': pixel_loss,
        'stokes': stokes_consistency,
        'polarization': sun_pol_loss,
        'magnetic': magnetic_loss,
        'poisson': poisson_loss,
        'spatial': spatial_loss,
        'adversarial': adv_loss if discriminator_output is not None else 0,
    }
    return total_loss, losses


if __name__ == "__main__":
    key = jax.random.PRNGKey(0)
    k1, k2, k3, k4, k5 = jax.random.split(key, 5)

    B, C, H, W = 2, 4, 16, 16   # (batch, Stokes I/Q/U/V, H, W)

    pred_I = jnp.abs(jax.random.normal(k1, (B, 1, H, W))) * 0.5 + 0.1
    pred_QUV = jax.random.normal(k2, (B, 3, H, W)) * 0.01
    pred = jnp.concatenate([pred_I, pred_QUV], axis=1).astype(jnp.float32)

    tgt_I = jnp.abs(jax.random.normal(k3, (B, 1, H, W))) * 0.5 + 0.1
    tgt_QUV = jax.random.normal(k4, (B, 3, H, W)) * 0.01
    target = jnp.concatenate([tgt_I, tgt_QUV], axis=1).astype(jnp.float32)

    disc_out = jax.random.normal(k5, (B, 1), dtype=jnp.float32)

    total, parts = stokes_loss(pred, target, disc_out)
    jax.block_until_ready(total)
    jax.block_until_ready(parts['pixel'])
    print("KERNEL_OK")
</pallas_src>

<mosaic_0001>
module attributes {stable_mosaic.version = 11 : i64} {
  func.func @_stokes_loss_kernel(%arg0: i32, %arg1: i32, %arg2: memref<1x4x16x16xf32, #tpu.memory_space<vmem>>, %arg3: memref<1x4x16x16xf32, #tpu.memory_space<vmem>>, %arg4: memref<1x16x16xf32, #tpu.memory_space<vmem>>) attributes {dimension_semantics = [#tpu.dimension_semantics<parallel>, #tpu.dimension_semantics<arbitrary>], iteration_bounds = array<i64: 1, 2>, scalar_prefetch = 0 : i64, scratch_operands = 0 : i64, tpu.core_type = #tpu.core_type<tc>, window_params = [{transform_indices = @transform_0, window_bounds = array<i64: 1, 4, 16, 16>}, {transform_indices = @transform_1, window_bounds = array<i64: 1, 4, 16, 16>}, {transform_indices = @transform_2, window_bounds = array<i64: 1, 16, 16>}]} {
    %c0 = arith.constant 0 : index
    %c0_0 = arith.constant 0 : index
    %c0_1 = arith.constant 0 : index
    %c0_2 = arith.constant 0 : index
    %0 = vector.load %arg2[%c0, %c0_0, %c0_1, %c0_2] : memref<1x4x16x16xf32, #tpu.memory_space<vmem>>, vector<1x4x16x16xf32>
    %1 = vector.shape_cast %0 : vector<1x4x16x16xf32> to vector<4x16x16xf32>
    %c0_3 = arith.constant 0 : index
    %c0_4 = arith.constant 0 : index
    %c0_5 = arith.constant 0 : index
    %c0_6 = arith.constant 0 : index
    %2 = vector.load %arg3[%c0_3, %c0_4, %c0_5, %c0_6] : memref<1x4x16x16xf32, #tpu.memory_space<vmem>>, vector<1x4x16x16xf32>
    %3 = vector.shape_cast %2 : vector<1x4x16x16xf32> to vector<4x16x16xf32>
    %cst = arith.constant 0.000000e+00 : f32
    %4 = vector.broadcast %cst : f32 to vector<16x16xf32>
    %5 = tpu.iota {dimensions = array<i32: 1>} : vector<16x16xi32>
    %6 = tpu.iota {dimensions = array<i32: 0>} : vector<16x16xi32>
    %c1_i32 = arith.constant 1 : i32
    %7 = vector.broadcast %c1_i32 : i32 to vector<16x16xi32>
    %8 = arith.cmpi sge, %5, %7 : vector<16x16xi32>
    %c2_i32 = arith.constant 2 : i32
    %9 = vector.broadcast %c2_i32 : i32 to vector<16x16xi32>
    %10 = arith.cmpi sge, %5, %9 : vector<16x16xi32>
    %c15_i32 = arith.constant 15 : i32
    %11 = vector.broadcast %c15_i32 : i32 to vector<16x16xi32>
    %12 = arith.cmpi slt, %5, %11 : vector<16x16xi32>
    %c14_i32 = arith.constant 14 : i32
    %13 = vector.broadcast %c14_i32 : i32 to vector<16x16xi32>
    %14 = arith.cmpi slt, %5, %13 : vector<16x16xi32>
    %c1_i32_7 = arith.constant 1 : i32
    %15 = vector.broadcast %c1_i32_7 : i32 to vector<16x16xi32>
    %16 = arith.cmpi sge, %6, %15 : vector<16x16xi32>
    %c2_i32_8 = arith.constant 2 : i32
    %17 = vector.broadcast %c2_i32_8 : i32 to vector<16x16xi32>
    %18 = arith.cmpi sge, %6, %17 : vector<16x16xi32>
    %c15_i32_9 = arith.constant 15 : i32
    %19 = vector.broadcast %c15_i32_9 : i32 to vector<16x16xi32>
    %20 = arith.cmpi slt, %6, %19 : vector<16x16xi32>
    %c14_i32_10 = arith.constant 14 : i32
    %21 = vector.broadcast %c14_i32_10 : i32 to vector<16x16xi32>
    %22 = arith.cmpi slt, %6, %21 : vector<16x16xi32>
    %23 = vector.extract_strided_slice %1 {offsets = [0, 0, 0], sizes = [1, 16, 16], strides = [1, 1, 1]} : vector<4x16x16xf32> to vector<1x16x16xf32>
    %24 = vector.shape_cast %23 : vector<1x16x16xf32> to vector<16x16xf32>
    %25 = vector.extract_strided_slice %1 {offsets = [1, 0, 0], sizes = [1, 16, 16], strides = [1, 1, 1]} : vector<4x16x16xf32> to vector<1x16x16xf32>
    %26 = vector.shape_cast %25 : vector<1x16x16xf32> to vector<16x16xf32>
    %27 = vector.extract_strided_slice %1 {offsets = [2, 0, 0], sizes = [1, 16, 16], strides = [1, 1, 1]} : vector<4x16x16xf32> to vector<1x16x16xf32>
    %28 = vector.shape_cast %27 : vector<1x16x16xf32> to vector<16x16xf32>
    %29 = vector.extract_strided_slice %1 {offsets = [3, 0, 0], sizes = [1, 16, 16], strides = [1, 1, 1]} : vector<4x16x16xf32> to vector<1x16x16xf32>
    %30 = vector.shape_cast %29 : vector<1x16x16xf32> to vector<16x16xf32>
    %31 = vector.extract_strided_slice %3 {offsets = [0, 0, 0], sizes = [1, 16, 16], strides = [1, 1, 1]} : vector<4x16x16xf32> to vector<1x16x16xf32>
    %32 = vector.shape_cast %31 : vector<1x16x16xf32> to vector<16x16xf32>
    %33 = vector.extract_strided_slice %3 {offsets = [1, 0, 0], sizes = [1, 16, 16], strides = [1, 1, 1]} : vector<4x16x16xf32> to vector<1x16x16xf32>
    %34 = vector.shape_cast %33 : vector<1x16x16xf32> to vector<16x16xf32>
    %35 = vector.extract_strided_slice %3 {offsets = [2, 0, 0], sizes = [1, 16, 16], strides = [1, 1, 1]} : vector<4x16x16xf32> to vector<1x16x16xf32>
    %36 = vector.shape_cast %35 : vector<1x16x16xf32> to vector<16x16xf32>
    %37 = vector.extract_strided_slice %3 {offsets = [3, 0, 0], sizes = [1, 16, 16], strides = [1, 1, 1]} : vector<4x16x16xf32> to vector<1x16x16xf32>
    %38 = vector.shape_cast %37 : vector<1x16x16xf32> to vector<16x16xf32>
    %39 = arith.subf %1, %3 : vector<4x16x16xf32>
    %40 = math.absf %39 : vector<4x16x16xf32>
    %cst_11 = arith.constant dense<0.000000e+00> : vector<16x16xf32>
    %41 = vector.multi_reduction <add>, %40, %cst_11 [0] : vector<4x16x16xf32> to vector<16x16xf32>
    %cst_12 = arith.constant dense<0.000000e+00> : vector<16xf32>
    %42 = vector.multi_reduction <add>, %41, %cst_12 [0] : vector<16x16xf32> to vector<16xf32>
    %43 = vector.shape_cast %42 : vector<16xf32> to vector<1x16xf32>
    %44 = arith.mulf %26, %26 : vector<16x16xf32>
    %45 = arith.mulf %28, %28 : vector<16x16xf32>
    %46 = arith.addf %44, %45 : vector<16x16xf32>
    %47 = arith.mulf %30, %30 : vector<16x16xf32>
    %48 = arith.addf %46, %47 : vector<16x16xf32>
    %49 = math.sqrt %48 : vector<16x16xf32>
    %50 = arith.mulf %34, %34 : vector<16x16xf32>
    %51 = arith.mulf %36, %36 : vector<16x16xf32>
    %52 = arith.addf %50, %51 : vector<16x16xf32>
    %53 = arith.mulf %38, %38 : vector<16x16xf32>
    %54 = arith.addf %52, %53 : vector<16x16xf32>
    %55 = math.sqrt %54 : vector<16x16xf32>
    %56 = arith.subf %49, %24 : vector<16x16xf32>
    %cst_13 = arith.constant 0.000000e+00 : f32
    %57 = vector.broadcast %cst_13 : f32 to vector<16x16xf32>
    %58 = arith.maximumf %56, %57 : vector<16x16xf32>
    %cst_14 = arith.constant dense<0.000000e+00> : vector<16xf32>
    %59 = vector.multi_reduction <add>, %58, %cst_14 [0] : vector<16x16xf32> to vector<16xf32>
    %60 = vector.shape_cast %59 : vector<16xf32> to vector<1x16xf32>
    %cst_15 = arith.constant 1.000000e-03 : f32
    %61 = vector.broadcast %cst_15 : f32 to vector<16x16xf32>
    %62 = arith.cmpf ogt, %24, %61 : vector<16x16xf32>
    %cst_16 = arith.constant 1.000000e-03 : f32
    %63 = vector.broadcast %cst_16 : f32 to vector<16x16xf32>
    %64 = arith.cmpf ogt, %32, %63 : vector<16x16xf32>
    %65 = arith.andi %62, %64 : vector<16x16xi1>
    %cst_17 = arith.constant 1.000000e-03 : f32
    %66 = vector.broadcast %cst_17 : f32 to vector<16x16xf32>
    %67 = arith.addf %24, %66 : vector<16x16xf32>
    %68 = tpu.reciprocal %67 {approx = true} : vector<16x16xf32> -> vector<16x16xf32>
    %69 = arith.mulf %49, %68 : vector<16x16xf32>
    %cst_18 = arith.constant 0.000000e+00 : f32
    %cst_19 = arith.constant 1.000000e+00 : f32
    %70 = vector.broadcast %cst_18 : f32 to vector<16x16xf32>
    %71 = arith.maximumf %70, %69 : vector<16x16xf32>
    %72 = vector.broadcast %cst_19 : f32 to vector<16x16xf32>
    %73 = arith.minimumf %72, %71 : vector<16x16xf32>
    %cst_20 = arith.constant 1.000000e-03 : f32
    %74 = vector.broadcast %cst_20 : f32 to vector<16x16xf32>
    %75 = arith.addf %32, %74 : vector<16x16xf32>
    %76 = tpu.reciprocal %75 {approx = true} : vector<16x16xf32> -> vector<16x16xf32>
    %77 = arith.mulf %55, %76 : vector<16x16xf32>
    %cst_21 = arith.constant 0.000000e+00 : f32
    %cst_22 = arith.constant 1.000000e+00 : f32
    %78 = vector.broadcast %cst_21 : f32 to vector<16x16xf32>
    %79 = arith.maximumf %78, %77 : vector<16x16xf32>
    %80 = vector.broadcast %cst_22 : f32 to vector<16x16xf32>
    %81 = arith.minimumf %80, %79 : vector<16x16xf32>
    %82 = arith.subf %73, %81 : vector<16x16xf32>
    %83 = arith.mulf %82, %82 : vector<16x16xf32>
    %84 = arith.select %65, %83, %4 : vector<16x16xi1>, vector<16x16xf32>
    %cst_23 = arith.constant dense<0.000000e+00> : vector<16xf32>
    %85 = vector.multi_reduction <add>, %84, %cst_23 [0] : vector<16x16xf32> to vector<16xf32>
    %86 = vector.shape_cast %85 : vector<16xf32> to vector<1x16xf32>
    %87 = arith.extui %65 : vector<16x16xi1> to vector<16x16xi32>
    %88 = arith.sitofp %87 : vector<16x16xi32> to vector<16x16xf32>
    %cst_24 = arith.constant dense<0.000000e+00> : vector<16xf32>
    %89 = vector.multi_reduction <add>, %88, %cst_24 [0] : vector<16x16xf32> to vector<16xf32>
    %90 = vector.shape_cast %89 : vector<16xf32> to vector<1x16xf32>
    %91 = math.absf %26 : vector<16x16xf32>
    %cst_25 = arith.constant 1.000000e-03 : f32
    %92 = vector.broadcast %cst_25 : f32 to vector<16x16xf32>
    %93 = arith.subf %91, %92 : vector<16x16xf32>
    %cst_26 = arith.constant 0.000000e+00 : f32
    %94 = vector.broadcast %cst_26 : f32 to vector<16x16xf32>
    %95 = arith.maximumf %93, %94 : vector<16x16xf32>
    %96 = math.absf %28 : vector<16x16xf32>
    %cst_27 = arith.constant 1.000000e-03 : f32
    %97 = vector.broadcast %cst_27 : f32 to vector<16x16xf32>
    %98 = arith.subf %96, %97 : vector<16x16xf32>
    %cst_28 = arith.constant 0.000000e+00 : f32
    %99 = vector.broadcast %cst_28 : f32 to vector<16x16xf32>
    %100 = arith.maximumf %98, %99 : vector<16x16xf32>
    %101 = arith.addf %95, %100 : vector<16x16xf32>
    %102 = math.absf %30 : vector<16x16xf32>
    %cst_29 = arith.constant 1.000000e-03 : f32
    %103 = vector.broadcast %cst_29 : f32 to vector<16x16xf32>
    %104 = arith.subf %102, %103 : vector<16x16xf32>
    %cst_30 = arith.constant 0.000000e+00 : f32
    %105 = vector.broadcast %cst_30 : f32 to vector<16x16xf32>
    %106 = arith.maximumf %104, %105 : vector<16x16xf32>
    %107 = arith.addf %101, %106 : vector<16x16xf32>
    %cst_31 = arith.constant dense<0.000000e+00> : vector<16xf32>
    %108 = vector.multi_reduction <add>, %107, %cst_31 [0] : vector<16x16xf32> to vector<16xf32>
    %109 = vector.shape_cast %108 : vector<16xf32> to vector<1x16xf32>
    %cst_32 = arith.constant 1.000000e-03 : f32
    %110 = vector.broadcast %cst_32 : f32 to vector<16x16xf32>
    %111 = arith.cmpf ogt, %55, %110 : vector<16x16xf32>
    %112 = arith.extui %111 : vector<16x16xi1> to vector<16x16xi32>
    %113 = arith.sitofp %112 : vector<16x16xi32> to vector<16x16xf32>
    %114 = arith.subf %24, %32 : vector<16x16xf32>
    %115 = arith.mulf %113, %114 : vector<16x16xf32>
    %116 = arith.mulf %115, %114 : vector<16x16xf32>
    %cst_33 = arith.constant dense<0.000000e+00> : vector<16xf32>
    %117 = vector.multi_reduction <add>, %116, %cst_33 [0] : vector<16x16xf32> to vector<16xf32>
    %118 = vector.shape_cast %117 : vector<16xf32> to vector<1x16xf32>
    %c1_i32_34 = arith.constant 1 : i32
    %119 = tpu.dynamic_rotate %24 by %c1_i32_34 dim 1 : vector<16x16xf32>, i32 -> vector<16x16xf32>
    %120 = arith.select %8, %119, %4 : vector<16x16xi1>, vector<16x16xf32>
    %121 = arith.addf %24, %120 : vector<16x16xf32>
    %c15_i32_35 = arith.constant 15 : i32
    %122 = tpu.dynamic_rotate %24 by %c15_i32_35 dim 1 : vector<16x16xf32>, i32 -> vector<16x16xf32>
    %123 = arith.select %12, %122, %4 : vector<16x16xi1>, vector<16x16xf32>
    %124 = arith.addf %121, %123 : vector<16x16xf32>
    %c2_i32_36 = arith.constant 2 : i32
    %125 = tpu.dynamic_rotate %24 by %c2_i32_36 dim 1 : vector<16x16xf32>, i32 -> vector<16x16xf32>
    %126 = arith.select %10, %125, %4 : vector<16x16xi1>, vector<16x16xf32>
    %127 = arith.addf %124, %126 : vector<16x16xf32>
    %c14_i32_37 = arith.constant 14 : i32
    %128 = tpu.dynamic_rotate %24 by %c14_i32_37 dim 1 : vector<16x16xf32>, i32 -> vector<16x16xf32>
    %129 = arith.select %14, %128, %4 : vector<16x16xi1>, vector<16x16xf32>
    %130 = arith.addf %127, %129 : vector<16x16xf32>
    %c1_i32_38 = arith.constant 1 : i32
    %131 = tpu.dynamic_rotate %130 by %c1_i32_38 dim 0 : vector<16x16xf32>, i32 -> vector<16x16xf32>
    %132 = arith.select %16, %131, %4 : vector<16x16xi1>, vector<16x16xf32>
    %133 = arith.addf %130, %132 : vector<16x16xf32>
    %c15_i32_39 = arith.constant 15 : i32
    %134 = tpu.dynamic_rotate %130 by %c15_i32_39 dim 0 : vector<16x16xf32>, i32 -> vector<16x16xf32>
    %135 = arith.select %20, %134, %4 : vector<16x16xi1>, vector<16x16xf32>
    %136 = arith.addf %133, %135 : vector<16x16xf32>
    %c2_i32_40 = arith.constant 2 : i32
    %137 = tpu.dynamic_rotate %130 by %c2_i32_40 dim 0 : vector<16x16xf32>, i32 -> vector<16x16xf32>
    %138 = arith.select %18, %137, %4 : vector<16x16xi1>, vector<16x16xf32>
    %139 = arith.addf %136, %138 : vector<16x16xf32>
    %c14_i32_41 = arith.constant 14 : i32
    %140 = tpu.dynamic_rotate %130 by %c14_i32_41 dim 0 : vector<16x16xf32>, i32 -> vector<16x16xf32>
    %141 = arith.select %22, %140, %4 : vector<16x16xi1>, vector<16x16xf32>
    %142 = arith.addf %139, %141 : vector<16x16xf32>
    %cst_42 = arith.constant 4.000000e-02 : f32
    %143 = vector.broadcast %cst_42 : f32 to vector<16x16xf32>
    %144 = arith.mulf %142, %143 : vector<16x16xf32>
    %145 = arith.subf %24, %144 : vector<16x16xf32>
    %146 = arith.mulf %145, %145 : vector<16x16xf32>
    %c1_i32_43 = arith.constant 1 : i32
    %147 = tpu.dynamic_rotate %146 by %c1_i32_43 dim 1 : vector<16x16xf32>, i32 -> vector<16x16xf32>
    %148 = arith.select %8, %147, %4 : vector<16x16xi1>, vector<16x16xf32>
    %149 = arith.addf %146, %148 : vector<16x16xf32>
    %c15_i32_44 = arith.constant 15 : i32
    %150 = tpu.dynamic_rotate %146 by %c15_i32_44 dim 1 : vector<16x16xf32>, i32 -> vector<16x16xf32>
    %151 = arith.select %12, %150, %4 : vector<16x16xi1>, vector<16x16xf32>
    %152 = arith.addf %149, %151 : vector<16x16xf32>
    %c2_i32_45 = arith.constant 2 : i32
    %153 = tpu.dynamic_rotate %146 by %c2_i32_45 dim 1 : vector<16x16xf32>, i32 -> vector<16x16xf32>
    %154 = arith.select %10, %153, %4 : vector<16x16xi1>, vector<16x16xf32>
    %155 = arith.addf %152, %154 : vector<16x16xf32>
    %c14_i32_46 = arith.constant 14 : i32
    %156 = tpu.dynamic_rotate %146 by %c14_i32_46 dim 1 : vector<16x16xf32>, i32 -> vector<16x16xf32>
    %157 = arith.select %14, %156, %4 : vector<16x16xi1>, vector<16x16xf32>
    %158 = arith.addf %155, %157 : vector<16x16xf32>
    %c1_i32_47 = arith.constant 1 : i32
    %159 = tpu.dynamic_rotate %158 by %c1_i32_47 dim 0 : vector<16x16xf32>, i32 -> vector<16x16xf32>
    %160 = arith.select %16, %159, %4 : vector<16x16xi1>, vector<16x16xf32>
    %161 = arith.addf %158, %160 : vector<16x16xf32>
    %c15_i32_48 = arith.constant 15 : i32
    %162 = tpu.dynamic_rotate %158 by %c15_i32_48 dim 0 : vector<16x16xf32>, i32 -> vector<16x16xf32>
    %163 = arith.select %20, %162, %4 : vector<16x16xi1>, vector<16x16xf32>
    %164 = arith.addf %161, %163 : vector<16x16xf32>
    %c2_i32_49 = arith.constant 2 : i32
    %165 = tpu.dynamic_rotate %158 by %c2_i32_49 dim 0 : vector<16x16xf32>, i32 -> vector<16x16xf32>
    %166 = arith.select %18, %165, %4 : vector<16x16xi1>, vector<16x16xf32>
    %167 = arith.addf %164, %166 : vector<16x16xf32>
    %c14_i32_50 = arith.constant 14 : i32
    %168 = tpu.dynamic_rotate %158 by %c14_i32_50 dim 0 : vector<16x16xf32>, i32 -> vector<16x16xf32>
    %169 = arith.select %22, %168, %4 : vector<16x16xi1>, vector<16x16xf32>
    %170 = arith.addf %167, %169 : vector<16x16xf32>
    %cst_51 = arith.constant 4.000000e-02 : f32
    %171 = vector.broadcast %cst_51 : f32 to vector<16x16xf32>
    %172 = arith.mulf %170, %171 : vector<16x16xf32>
    %173 = arith.subf %172, %144 : vector<16x16xf32>
    %174 = arith.mulf %173, %173 : vector<16x16xf32>
    %cst_52 = arith.constant dense<0.000000e+00> : vector<16xf32>
    %175 = vector.multi_reduction <add>, %174, %cst_52 [0] : vector<16x16xf32> to vector<16xf32>
    %176 = vector.shape_cast %175 : vector<16xf32> to vector<1x16xf32>
    %c15_i32_53 = arith.constant 15 : i32
    %177 = tpu.dynamic_rotate %24 by %c15_i32_53 dim 1 : vector<16x16xf32>, i32 -> vector<16x16xf32>
    %178 = arith.subf %177, %24 : vector<16x16xf32>
    %179 = math.absf %178 : vector<16x16xf32>
    %180 = arith.select %12, %179, %4 : vector<16x16xi1>, vector<16x16xf32>
    %cst_54 = arith.constant dense<0.000000e+00> : vector<16xf32>
    %181 = vector.multi_reduction <add>, %180, %cst_54 [0] : vector<16x16xf32> to vector<16xf32>
    %182 = vector.shape_cast %181 : vector<16xf32> to vector<1x16xf32>
    %c15_i32_55 = arith.constant 15 : i32
    %183 = tpu.dynamic_rotate %24 by %c15_i32_55 dim 0 : vector<16x16xf32>, i32 -> vector<16x16xf32>
    %184 = arith.subf %183, %24 : vector<16x16xf32>
    %185 = math.absf %184 : vector<16x16xf32>
    %186 = arith.select %20, %185, %4 : vector<16x16xi1>, vector<16x16xf32>
    %cst_56 = arith.constant dense<0.000000e+00> : vector<16xf32>
    %187 = vector.multi_reduction <add>, %186, %cst_56 [0] : vector<16x16xf32> to vector<16xf32>
    %188 = vector.shape_cast %187 : vector<16xf32> to vector<1x16xf32>
    %cst_57 = arith.constant 0.000000e+00 : f32
    %189 = vector.broadcast %cst_57 : f32 to vector<7x16xf32>
    %190 = tpu.concatenate %43, %60, %86, %90, %109, %118, %176, %182, %188, %189 in 0 : vector<1x16xf32>, vector<1x16xf32>, vector<1x16xf32>, vector<1x16xf32>, vector<1x16xf32>, vector<1x16xf32>, vector<1x16xf32>, vector<1x16xf32>, vector<1x16xf32>, vector<7x16xf32> -> vector<16x16xf32>
    %c0_i32 = arith.constant 0 : i32
    %191 = arith.cmpi eq, %arg1, %c0_i32 : i32
    %192 = arith.extui %191 : i1 to i32
    %c0_i32_58 = arith.constant 0 : i32
    %193 = arith.cmpi ne, %192, %c0_i32_58 : i32
    scf.if %193 {
      %cst_65 = arith.constant 0.000000e+00 : f32
      %200 = vector.broadcast %cst_65 : f32 to vector<16x16xf32>
      %c0_66 = arith.constant 0 : index
      %c0_67 = arith.constant 0 : index
      %c0_68 = arith.constant 0 : index
      %201 = vector.load %arg4[%c0_66, %c0_67, %c0_68] : memref<1x16x16xf32, #tpu.memory_space<vmem>>, vector<1x16x16xf32>
      %202 = vector.shape_cast %201 : vector<1x16x16xf32> to vector<16x16xf32>
      %203 = vector.shape_cast %200 : vector<16x16xf32> to vector<1x16x16xf32>
      tpu.vector_store %arg4[%c0_66, %c0_67, %c0_68], %203 {strides = array<i32>} : memref<1x16x16xf32, #tpu.memory_space<vmem>>, vector<1x16x16xf32>,
    } else {
    }
    %c0_59 = arith.constant 0 : index
    %c0_60 = arith.constant 0 : index
    %c0_61 = arith.constant 0 : index
    %194 = vector.load %arg4[%c0_59, %c0_60, %c0_61] : memref<1x16x16xf32, #tpu.memory_space<vmem>>, vector<1x16x16xf32>
    %195 = vector.shape_cast %194 : vector<1x16x16xf32> to vector<16x16xf32>
    %196 = arith.addf %195, %190 : vector<16x16xf32>
    %c0_62 = arith.constant 0 : index
    %c0_63 = arith.constant 0 : index
    %c0_64 = arith.constant 0 : index
    %197 = vector.load %arg4[%c0_62, %c0_63, %c0_64] : memref<1x16x16xf32, #tpu.memory_space<vmem>>, vector<1x16x16xf32>
    %198 = vector.shape_cast %197 : vector<1x16x16xf32> to vector<16x16xf32>
    %199 = vector.shape_cast %196 : vector<16x16xf32> to vector<1x16x16xf32>
    tpu.vector_store %arg4[%c0_62, %c0_63, %c0_64], %199 {strides = array<i32>} : memref<1x16x16xf32, #tpu.memory_space<vmem>>, vector<1x16x16xf32>,
    return
  }
  func.func @transform_0(%arg0: i32, %arg1: i32) -> (i32, i32, i32, i32) {
    %c2_i32 = arith.constant 2 : i32
    %0 = arith.muli %arg0, %c2_i32 : i32
    %1 = arith.addi %0, %arg1 : i32
    %c0_i32 = arith.constant 0 : i32
    %c0_i32_0 = arith.constant 0 : i32
    %c0_i32_1 = arith.constant 0 : i32
    %c0_i32_2 = arith.constant 0 : i32
    return %1, %c0_i32, %c0_i32_0, %c0_i32_1 : i32, i32, i32, i32
  }
  func.func @transform_1(%arg0: i32, %arg1: i32) -> (i32, i32, i32, i32) {
    %c2_i32 = arith.constant 2 : i32
    %0 = arith.muli %arg0, %c2_i32 : i32
    %1 = arith.addi %0, %arg1 : i32
    %c0_i32 = arith.constant 0 : i32
    %c0_i32_0 = arith.constant 0 : i32
    %c0_i32_1 = arith.constant 0 : i32
    %c0_i32_2 = arith.constant 0 : i32
    return %1, %c0_i32, %c0_i32_0, %c0_i32_1 : i32, i32, i32, i32
  }
  func.func @transform_2(%arg0: i32, %arg1: i32) -> (i32, i32, i32) {
    %c0_i32 = arith.constant 0 : i32
    %c0_i32_0 = arith.constant 0 : i32
    %c0_i32_1 = arith.constant 0 : i32
    return %arg0, %c0_i32, %c0_i32_0 : i32, i32, i32
  }
}

</mosaic_0001>

<bundles_post_ra>
// kernel: tpu_custom_call.1
= control target key start
LH: loop header
LB: loop body
LE: loop exit
PB: predicated region body
PF: predicated region fallthrough
CT: control target
= control target key end

     0   :  { %7 = vsyncpa [#allocation3], 0  ;;  %s1733_s0 = inlined_call_operand.hbm [shape: f32[2,4,16,16], index: 0, kind: input, shape index: {}]   ;;  %s1734_s1 = inlined_call_operand.hbm [shape: f32[2,4,16,16], index: 1, kind: input, shape index: {}]   ;;  %s1735_s2 = inlined_call_operand.hbm [shape: f32[1,16,16], index: 2, kind: output, shape index: {}]  }
   0x1   :  { %9 = vsyncpa [#allocation3 + $0x1], 0 }
   0x2   :  { %10 = vsyncpa [#allocation6], 0 }
   0x3   :  { %12 = vsyncpa [#allocation6 + $0x1], 0 }
   0x4   :  { %13 = vsyncpa [#allocation4], 0  ;;  %s1162_s9 = smov 0   ;;  %s1164_s10 = smov 0  }
   0x5   :  { %s1166_s11 = smov 0   ;;  %s1168_s12 = smov 0  }
   0x6   :  { %s1170_s13 = smov 0   ;;  %s1172_s14 = smov 0  }
   0x7 LB: > { %s862_s15 = sadd.s32 4294967295, %s1132_s14   ;;  %s28_s16 = sadd.s32 1, %s1128_s13  ;;  %s1132_s14 = sphi %s1172_s14, %s19_s14   ;;  %s1128_s13 = sphi %s1170_s13, %s1757_s13   ;;  %s1124_s12 = sphi %s1168_s12, %s1756_s12   ;;  %s1120_s11 = sphi %s1166_s11, %s1755_s11   ;;  %s1116_s10 = sphi %s1164_s10, %s1754_s10   ;;  %s1112_s9 = sphi %s1162_s9, %s1753_s9  }
   0x8   : > { %p29_p0 = scmp.ge.s32.totalorder %s28_s16, 2  ;;  %s42_s17 = sadd.s32 1, %s1120_s11 }
   0x9   : > { %p49_p1 = scmp.ne.s32.totalorder %s1120_s11, %s1116_s10  ;;  %p50_p2 = scmp.eq.s32.totalorder %s1132_s14, 0 }
   0xa   : > { %s1759_s16 = smov (%p29_p0, %s28_s16), 0  ;;  %p55_p4 = scmp.ne.s32.totalorder %s1116_s10, %s1112_s9 }
   0xb   : > { %p1198_p3 = por %p50_p2, %p49_p1  ;;  %s39_s19 = ssub.s32 %s1128_s13, %s1759_s16 }
   0xc   : > { %p56_p5 = scmp.eq.s32.totalorder %s862_s15, 0  ;;  %p40_p6 = scmp.eq.s32.totalorder %s39_s19, 0 }
   0xd   : > { %p906_p8 = scmp.lt.s32.totalorder %s1132_s14, 2  ;;  %s1216_s22 = sand.u32 1, %s1120_s11  }
   0xe   : > { %p1207_p7 = por %p56_p5, %p55_p4  ;;  %s889_s23 = sshll.u32 %s1128_s13, 6 }
   0xf   : > { %s1213_s21 = scalar_select %p40_p6, %s1120_s11, %s42_s17  }
  0x10   : > { %s865_s24 = sshll.u32 %s1216_s22, 6  ;;  %s146_s27 = scalar_lea.hbm %s1733_s0, %s889_s23 }
  0x11   : > { %s147_s28 = sshll.u32 %s146_s27, 4  ;;  %s139_s29 = scalar_lea.vmem [#allocation2], %s865_s24  ;;  %s148_s28 = int_to_ptr.hbm [resolvable:$true] %s147_s28 }
  0x12   : > { %s149_s30 = sshll.u32 %s139_s29, 4  ;;  %p1225_p9 = pnand %p906_p8, %p1198_p3  ;;  %s150_s30 = int_to_ptr.vmem [resolvable:$true] %s149_s30 }
  0x13   : > { %p871_p10 = scmp.ge.s32.totalorder %s1132_s14, 1  ;;  %p181_p11 = scmp.lt.s32.totalorder %s1132_s14, 3 }
  0x14   : > { %s136_s4 = scalar_lea.sflag [#allocation3], %s1216_s22  ;;  %s1134_s5 = smov 128  }
  0x15   : > { %s1135_s6 = smov 8   ;;  %p182_p12 = pnand %p871_p10, %p181_p11 }
  0x16   : > { %902 = dma.hbm_to_vmem [thread:$0]  (!%p1225_p9), %s148_s28, 1024, %s150_s30, %s136_s4, %s1134_s5, %s1134_s5, %s1135_s6  }
  0x17   : > { %s170_s9 = scalar_lea.hbm %s1734_s1, %s889_s23  ;;  %s163_s18 = scalar_lea.vmem [#allocation5], %s865_s24 }
  0x18   : > { %s171_s17 = sshll.u32 %s170_s9, 4  ;;  %s173_s19 = sshll.u32 %s163_s18, 4  ;;  %s172_s17 = int_to_ptr.hbm [resolvable:$true] %s171_s17  ;;  %s174_s19 = int_to_ptr.vmem [resolvable:$true] %s173_s19 }
  0x19   : > { %s160_s25 = scalar_lea.sflag [#allocation6], %s1216_s22  ;;  %185 = sbr.rel (%p182_p12) target bundleno = 837 (0x345), region = 28 }
  0x1a   : > { %905 = dma.hbm_to_vmem [thread:$0]  (!%p1225_p9), %s172_s17, 1024, %s174_s19, %s160_s25, %s1134_s5, %s1134_s5, %s1135_s6  }
  0x1b   : > { %s187_s26 = sand.u32 (!%p182_p12), 1, %s1116_s10  }
  0x1c   : > { %s872_s27 = sshll.u32 (!%p182_p12), %s187_s26, 6  ;;  %s188_s29 = scalar_lea.sflag (!%p182_p12), [#allocation3], %s187_s26 }
  0x1d   : > { %s1241_s28 = scalar_lea.vmem (!%p182_p12), [#allocation2], %s872_s27 }
  0x1e   : > { %1099 = dma.done.wait (%p1207_p7), %s188_s29, 1024  }
  0x1f   : > { %1101 = vsyncadd (%p1207_p7), %s188_s29, 4294966272  ;;  %s198_s23 = scalar_lea.sflag [#allocation6], %s187_s26  ;;  %s1247_s24 = scalar_lea.vmem [#allocation5], %s872_s27 }
  0x20   : > { %1103 = dma.done.wait (%p1207_p7), %s198_s23, 1024  }
  0x21   : > { %1105 = vsyncadd (%p1207_p7), %s198_s23, 4294966272  ;;  %v1254_v0 = vld [vmem:[%s1241_s28] sm:$0xff]  ;;  %s1136_s22 = smov 16   ;;  %v1259_v1 = vld [vmem:[%s1241_s28 + $0x8] sm:$0xff]  ;;  %vm485_vm0 = vcmask 1047680   ;;  %s1137_s20 = smov 127   ;;  %v243_v12 = vlaneseq }
  0x22   : > { %486 = vrot.lane.b32.xlu0 %v1254_v0, %s1136_s22  ;;  %s1138_s30 = smov 113   ;;  %s1139_s3 = smov 114   ;;  %v715_v17 = vrot.slane %v1259_v1, 1  ;;  %v714_v19 = vrot.slane %v1254_v0, 1  ;;  %vm276_vm7 = vcmask 130048   ;;  %vm1736_vm14 = vcmask 1040384  }
  0x23   : > { %s1140_s4 = smov 126   ;;  %v1293_v13 = vand.u32 127, %v243_v12  ;;  %v1295_v15 = vshrl.u32 %v243_v12, 7  ;;  %s1141_s5 = smov 1  }
  0x24   : > { %p884_p13 = scmp.ne.s32.totalorder %s1124_s12, 0 }
  0x25   : > { %vm248_vm1 = vcmp.ge.s32.totalorder %v1293_v13, 1  ;;  %vm250_vm2 = vcmp.lt.s32.totalorder %v1293_v13, 15  ;;  %vm551_vm3 = vcmp.lt.s32.totalorder %v1295_v15, 7  ;;  %v1307_v21 = vadd.s32 8, %v1295_v15 }
  0x26   : > { %v716_v22 = vsel %vm551_vm3, %v714_v19, %v715_v17  ;;  %v717_v23 = vsel %vm551_vm3, %v715_v17, %v714_v19  ;;  %vm249_vm4 = vcmp.ge.s32.totalorder %v1293_v13, 2  ;;  %vm251_vm5 = vcmp.lt.s32.totalorder %v1293_v13, 14 }
  0x27   : > { %v718_v27 = vsub.f32 %v716_v22, %v1254_v0  ;;  %v719_v28 = vsub.f32 %v717_v23, %v1259_v1  ;;  %vm257_vm6 = vcmp.lt.s32.totalorder %v1307_v21, 15  ;;  %vm252_vm8 = vcmp.ge.s32.totalorder %v1295_v15, 1 }
  0x28   : > { %vm542_vm9 = vcmp.lt.s32.totalorder %v1295_v15, 1  ;;  %vm560_vm10 = vcmp.lt.s32.totalorder %v1295_v15, 2  ;;  %vm1739_vm11 = vcmp.lt.s32.totalorder %v1295_v15, 6  ;;  %vm1737_vm12 = vcmp.lt.s32.totalorder %v1307_v21, 14 }
  0x29   : > { %v720_v33 = vand.u32 2147483647, %v718_v27  ;;  %v721_v34 = vand.u32 2147483647, %v719_v28  ;;  %vm1738_vm13 = vcmp.ge.s32.totalorder %v1295_v15, 2 }
  0x2a   : > { %489 = vrot.lane.b32.xlu0 %v1259_v1, %s1136_s22 }
  0x2b   : > { %v723_v39 = vsel %vm257_vm6, %v721_v34, 0.0  ;;  %v724_v40 = vsel %vm276_vm7, %v720_v33, 0.0 }
  0x2c   : > { %v725_v41 = vsel %vm276_vm7, %v723_v39, 0.0 }
  0x2d   : > { %v726_v42 = vadd.f32 %v725_v41, %v724_v40 }
  0x2f   : > { %v727_v49 = vrot.slane %v726_v42, 4 }
  0x31   : > { %v728_v51 = vadd.f32 %v727_v49, %v726_v42  ;;  %v1416_v49 = vld [vmem:[%s1241_s28 + $0x20] sm:$0xff] }
  0x33   : > { %v729_v58 = vrot.slane %v728_v51, 2 }
  0x94   : > { %v487_v2 = vpop.permute.xlu0 %486 }
  0x95   : > { %v488_v3 = vsel %vm485_vm0, %v487_v2, %v1254_v0 }
  0x96   : > { %492 = vrot.lane.b32.xlu1 %v488_v3, %s1136_s22 }
  0x9c   : > { %v490_v4 = vpop.permute.xlu0 %489 }
  0x9d   : > { %v491_v5 = vsel %vm485_vm0, %v490_v4, %v1259_v1 }
  0x9e   : > { %494 = vrot.lane.b32.xlu1 %v491_v5, %s1136_s22 }
 0x108   : > { %v493_v6 = vpop.permute.xlu1 %492 }
 0x109   : > { %v1271_v7 = vsel %vm485_vm0, %v493_v6, %v1254_v0  ;;  %v730_v6 = vadd.f32 %v729_v58, %v728_v51  ;;  %v1422_v51 = vld [vmem:[%s1247_s24 + $0x10] sm:$0xff] }
 0x10a   : > { %510 = vrot.lane.b32.xlu0 %v1271_v7, %s1137_s20  ;;  %500 = vrot.lane.b32.xlu2 %v1271_v7, %s1138_s30 }
 0x110   : > { %v495_v8 = vpop.permute.xlu1 %494 }
 0x111   : > { %v1279_v9 = vsel %vm485_vm0, %v495_v8, %v1259_v1 }
 0x112   : > { %522 = vrot.lane.b32.xlu0 %v1279_v9, %s1139_s3  ;;  %512 = vrot.lane.b32.xlu1 %v1279_v9, %s1137_s20 }
 0x113   : > { %502 = vrot.lane.b32.xlu2 %v1279_v9, %s1138_s30 }
 0x11a   : > { %530 = vrot.lane.b32.xlu1 %v1271_v7, %s1140_s4 }
 0x11b   : > { %520 = vrot.lane.b32.xlu2 %v1271_v7, %s1139_s3 }
 0x123   : > { %532 = vrot.lane.b32.xlu2 %v1279_v9, %s1140_s4 }
 0x164   : > { %v501_v10 = vpop.permute.xlu2 %500 }
 0x165   : > { %v506_v20 = vsel %vm248_vm1, %v501_v10, 0.0 }
 0x166   : > { %v508_v31 = vadd.f32 %v506_v20, %v1254_v0 }
 0x16d   : > { %v503_v11 = vpop.permute.xlu2 %502 }
 0x16e   : > { %v507_v18 = vsel %vm248_vm1, %v503_v11, 0.0 }
 0x16f   : > { %v509_v24 = vadd.f32 %v507_v18, %v1259_v1 }
 0x175   : > { %v521_v16 = vpop.permute.xlu2 %520 }
 0x176   : > { %v526_v43 = vsel %vm249_vm4, %v521_v16, 0.0  ;;  %v731_v16 = vrot.slane %v730_v6, 1 }
 0x178   : > { %v732_v22 = vadd.f32 %v731_v16, %v730_v6 }
 0x17c   : > { %v511_v14 = vpop.permute.xlu0 %510 }
 0x17d   : > { %v516_v29 = vsel %vm250_vm2, %v511_v14, 0.0  ;;  %v533_v36 = vpop.permute.xlu2 %532 }
 0x17e   : > { %v518_v37 = vadd.f32 %v516_v29, %v508_v31  ;;  %v537_v44 = vsel %vm251_vm5, %v533_v36, 0.0 }
 0x180   : > { %v528_v47 = vadd.f32 %v526_v43, %v518_v37 }
 0x184   : > { %v513_v25 = vpop.permute.xlu1 %512  ;;  %v523_v26 = vpop.permute.xlu0 %522 }
 0x185   : > { %v517_v30 = vsel %vm250_vm2, %v513_v25, 0.0  ;;  %v527_v35 = vsel %vm249_vm4, %v523_v26, 0.0  ;;  %v1367_v26 = vsel %vm1736_vm14, %v732_v22, 0.0 }
 0x186   : > { %v519_v32 = vadd.f32 %v517_v30, %v509_v24 }
 0x188   : > { %v529_v38 = vadd.f32 %v527_v35, %v519_v32 }
 0x18a   : > { %v539_v45 = vadd.f32 %v537_v44, %v529_v38 }
 0x18c   : > { %v531_v46 = vpop.permute.xlu1 %530  ;;  %v541_v52 = vrot.slane %v539_v45, 7  ;;  %v550_v53 = vrot.slane %v539_v45, 1  ;;  %v559_v59 = vrot.slane %v539_v45, 6  ;;  %v568_v63 = vrot.slane %v539_v45, 2 }
 0x18d   : > { %v536_v48 = vsel %vm251_vm5, %v531_v46, 0.0 }
 0x18e   : > { %v538_v50 = vadd.f32 %v536_v48, %v528_v47  ;;  %v1413_v48 = vld [vmem:[%s1241_s28 + $0x18] sm:$0xff] }
 0x190   : > { %v540_v54 = vrot.slane %v538_v50, 7  ;;  %v549_v55 = vrot.slane %v538_v50, 1  ;;  %v558_v56 = vrot.slane %v538_v50, 6  ;;  %v567_v57 = vrot.slane %v538_v50, 2 }
 0x192   : > { %v544_v60 = vsel %vm542_vm9, %v541_v52, %v540_v54  ;;  %v543_v61 = vsel %vm542_vm9, %v540_v54, %v541_v52  ;;  %v553_v62 = vsel %vm551_vm3, %v550_v53, %v549_v55  ;;  %v571_v10 = vsel %vm1739_vm11, %v568_v63, %v567_v57  ;;  %v1425_v52 = vld [vmem:[%s1247_s24 + $0x18] sm:$0xff] }
 0x193   : > { %v545_v2 = vsel %vm252_vm8, %v544_v60, 0.0  ;;  %v548_v3 = vadd.f32 %v543_v61, %v539_v45  ;;  %v555_v4 = vsel %vm257_vm6, %v553_v62, 0.0  ;;  %v552_v11 = vsel %vm551_vm3, %v549_v55, %v550_v53  ;;  %v1434_v55 = vld [vmem:[%s1241_s28 + $0x30] sm:$0xff]  ;;  %v1449_v61 = vld [vmem:[%s1247_s24 + $0x28] sm:$0xff] }
 0x194   : > { %v547_v5 = vadd.f32 %v545_v2, %v538_v50  ;;  %v562_v12 = vsel %vm560_vm10, %v559_v59, %v558_v56  ;;  %v561_v14 = vsel %vm560_vm10, %v558_v56, %v559_v59  ;;  %v573_v20 = vsel %vm1737_vm12, %v571_v10, 0.0  ;;  %v1419_v50 = vld [vmem:[%s1241_s28 + $0x28] sm:$0xff]  ;;  %v1437_v56 = vld [vmem:[%s1241_s28 + $0x38] sm:$0xff]  ;;  %v1452_v62 = vld [vmem:[%s1247_s24 + $0x30] sm:$0xff] }
 0x195   : > { %v557_v8 = vadd.f32 %v555_v4, %v548_v3  ;;  %v563_v19 = vsel %vm1738_vm13, %v562_v12, 0.0  ;;  %v570_v25 = vsel %vm1739_vm11, %v567_v57, %v568_v63  ;;  %v301_v53 = vmul.f32 %v1413_v48, %v1413_v48  ;;  %v1440_v57 = vld [vmem:[%s1247_s24 + $0x20] sm:$0xff]  ;;  %v1455_v63 = vld [vmem:[%s1247_s24 + $0x38] sm:$0xff] }
 0x196   : > { %v556_v17 = vadd.f32 %v552_v11, %v547_v5  ;;  %v302_v54 = vmul.f32 %v1416_v49, %v1416_v49  ;;  %v303_v58 = vmul.f32 %v1419_v50, %v1419_v50  ;;  %v334_v59 = vmul.f32 %v1422_v51, %v1422_v51 }
 0x197   : > { %v566_v18 = vadd.f32 %v561_v14, %v557_v8  ;;  %v335_v60 = vmul.f32 %v1425_v52, %v1425_v52  ;;  %v306_v3 = vmul.f32 %v1434_v55, %v1434_v55  ;;  %v307_v4 = vmul.f32 %v1437_v56, %v1437_v56 }
 0x198   : > { %v565_v23 = vadd.f32 %v563_v19, %v556_v17  ;;  %v336_v5 = vmul.f32 %v1440_v57, %v1440_v57  ;;  %v305_v6 = vadd.f32 %v303_v58, %v301_v53  ;;  %v337_v8 = vmul.f32 %v1449_v61, %v1449_v61 }
 0x199   : > { %v575_v24 = vadd.f32 %v573_v20, %v566_v18  ;;  %v340_v10 = vmul.f32 %v1452_v62, %v1452_v62  ;;  %v341_v11 = vmul.f32 %v1455_v63, %v1455_v63 }
 0x19a   : > { %v574_v27 = vadd.f32 %v570_v25, %v565_v23  ;;  %v338_v14 = vadd.f32 %v336_v5, %v334_v59  ;;  %v1471_v16 = vadd.f32 %v307_v4, %v305_v6  ;;  %v339_v17 = vadd.f32 %v337_v8, %v335_v60 }
 0x19b   : > { %v1369_v28 = vmul.f32 0.04, %v575_v24  ;;  %v387_v8 = vadd.f32 0.001, %v1254_v0 }
 0x19c   : > { %v1371_v29 = vmul.f32 0.04, %v574_v27  ;;  %v1474_v18 = vadd.f32 %v340_v10, %v338_v14  ;;  %v1477_v19 = vadd.f32 %v341_v11, %v339_v17  ;;  %v263_v11 = vsub.f32 %v1413_v48, %v1425_v52 }
 0x19d   : > { %v579_v30 = vsub.f32 %v1259_v1, %v1369_v28  ;;  %v332_v52 = vand.u32 2147483648, %v1471_v16  ;;  %vm331_vm12 = vcmp.eq.f32.partialorder %v1471_v16, 0.0 }
 0x19e   : > { %v578_v31 = vsub.f32 %v1254_v0, %v1371_v29  ;;  %vm363_vm13 = vcmp.eq.f32.partialorder %v1477_v19, inf  ;;  %vm365_vm11 = vcmp.eq.f32.partialorder %v1477_v19, 0.0 }
 0x19f   : > { %v1377_v32 = vmul.f32 %v579_v30, %v579_v30 }
 0x1a0   : > { %v1379_v33 = vmul.f32 %v578_v31, %v578_v31 }
 0x1a1   : > { %585 = vrot.lane.b32.xlu1 %v1377_v32, %s1136_s22 }
 0x1a2   : > { %582 = vrot.lane.b32.xlu0 %v1379_v33, %s1136_s22 }
 0x1a9   : > { %685 = vrot.lane.b32.xlu1 %v1254_v0, %s1141_s5 }
 0x213   : > { %v586_v34 = vpop.permute.xlu1 %585 }
 0x214   : > { %v583_v35 = vpop.permute.xlu0 %582  ;;  %v587_v36 = vsel %vm485_vm0, %v586_v34, %v1377_v32 }
 0x215   : > { %590 = vrot.lane.b32.xlu0 %v587_v36, %s1136_s22  ;;  %v584_v37 = vsel %vm485_vm0, %v583_v35, %v1379_v33 }
 0x216   : > { %588 = vrot.lane.b32.xlu2 %v584_v37, %s1136_s22 }
 0x21b   : > { %v686_v41 = vpop.permute.xlu1 %685 }
 0x21c   : > { %v691_v43 = vsub.f32 %v1271_v7, %v686_v41  ;;  %v1410_v7 = vld [vmem:[%s1241_s28 + $0x10] sm:$0xff] }
 0x21d   : > { %v262_v17 = vsub.f32 %v1410_v7, %v1422_v51 }
 0x21e   : > { %687 = vrot.lane.b32.xlu2 %v1259_v1, %s1141_s5  ;;  %v693_v44 = vand.u32 2147483647, %v691_v43 }
 0x270   : > { %v589_v38 = vpop.permute.xlu2 %588 }
 0x271   : > { %v592_v39 = vsel %vm485_vm0, %v589_v38, %v1379_v33 }
 0x272   : > { %606 = vrot.lane.b32.xlu2 %v592_v39, %s1137_s20 }
 0x278   : > { %v688_v45 = vpop.permute.xlu2 %687 }
 0x279   : > { %v692_v46 = vsub.f32 %v1279_v9, %v688_v45  ;;  %v300_v9 = vmul.f32 %v1410_v7, %v1410_v7 }
 0x27b   : > { %v694_v47 = vand.u32 2147483647, %v692_v46  ;;  %v304_v2 = vadd.f32 %v302_v54, %v300_v9  ;;  %v388_v46 = vadd.f32 0.001, %v1259_v1 }
 0x27d   : > { %v1469_v12 = vadd.f32 %v306_v3, %v304_v2 }
 0x27f   : > { %970 = vrsqrt.f32 %v1469_v12  ;;  %vm317_vm15 = vcmp.eq.f32.partialorder %v1469_v12, inf  ;;  %vm319_vm14 = vcmp.eq.f32.partialorder %v1469_v12, 0.0 }
 0x280   : > { %972 = vrsqrt.f32 %v1471_v16 }
 0x281   : > { %974 = vrsqrt.f32 %v1474_v18 }
 0x282   : > { %976 = vrsqrt.f32 %v1477_v19 }
 0x283   : > { %978 = vrcp.f32 %v388_v46 }
 0x285   : > { %v971_v20 = vpop.eup %970 }
 0x286   : > { %v973_v22 = vpop.eup %972  ;;  %v311_v24 = vmul.f32 %v971_v20, %v1469_v12 }
 0x287   : > { %v591_v40 = vpop.permute.xlu0 %590  ;;  %v975_v25 = vpop.eup %974  ;;  %v323_v27 = vmul.f32 %v973_v22, %v1471_v16 }
 0x288   : > { %v593_v42 = vsel %vm485_vm0, %v591_v40, %v1377_v32  ;;  %v1483_v30 = vpop.eup %976  ;;  %v312_v31 = vmul.f32 %v971_v20, %v311_v24  ;;  %v345_v34 = vmul.f32 %v975_v25, %v1474_v18  ;;  %vm329_vm0 = vcmp.eq.f32.partialorder %v1471_v16, inf }
 0x289   : > { %618 = vrot.lane.b32.xlu2 %v593_v42, %s1139_s3  ;;  %608 = vrot.lane.b32.xlu0 %v593_v42, %s1137_s20  ;;  %v324_v35 = vmul.f32 %v973_v22, %v323_v27  ;;  %v357_v36 = vmul.f32 %v1483_v30, %v1477_v19 }
 0x28a   : > { %598 = vrot.lane.b32.xlu1 %v593_v42, %s1138_s30  ;;  %v313_v37 = vmul.f32 0.5, %v312_v31  ;;  %v346_v38 = vmul.f32 %v975_v25, %v345_v34  ;;  %v979_v31 = vpop.eup %978  ;;  %v264_v34 = vsub.f32 %v1416_v49, %v1440_v57 }
 0x28b   : > { %v325_v40 = vmul.f32 0.5, %v324_v35  ;;  %v358_v41 = vmul.f32 %v1483_v30, %v357_v36 }
 0x28c   : > { %v347_v43 = vmul.f32 0.5, %v346_v38 }
 0x28d   : > { %v326_v45 = vsub.f32 1.5, %v325_v40  ;;  %v359_v59 = vmul.f32 0.5, %v358_v41 }
 0x28e   : > { %v348_v53 = vsub.f32 1.5, %v347_v43 }
 0x28f   : > { %v327_v58 = vmul.f32 %v973_v22, %v326_v45  ;;  %v360_v14 = vsub.f32 1.5, %v359_v59  ;;  %v320_v22 = vand.u32 2147483648, %v1469_v12 }
 0x290   : > { %v349_v6 = vmul.f32 %v975_v25, %v348_v53  ;;  %v271_v25 = vand.u32 2147483647, %v263_v11 }
 0x291   : > { %596 = vrot.lane.b32.xlu0 %v592_v39, %s1138_s30  ;;  %697 = vrot.lane.b32.xlu2 %v693_v44, %s1137_s20  ;;  %v1493_v44 = vld [vmem:[%s1247_s24 + $0x8] sm:$0xff]  ;;  %v328_v5 = vmul.f32 %v327_v58, %v1471_v16  ;;  %v361_v53 = vmul.f32 %v1483_v30, %v360_v14  ;;  %v272_v58 = vand.u32 2147483647, %v264_v34 }
 0x292   : > { %616 = vrot.lane.b32.xlu1 %v592_v39, %s1139_s3  ;;  %v398_v2 = vadd.f32 0.001, %v1493_v44  ;;  %v1512_v10 = vsub.f32 %v1259_v1, %v1493_v44  ;;  %v350_v51 = vmul.f32 %v349_v6, %v1474_v18  ;;  %v285_v40 = vsel %vm276_vm7, %v271_v25, 0.0 }
 0x293   : > { %v330_v27 = vsel %vm329_vm0, %v1471_v16, %v328_v5  ;;  %vm353_vm0 = vcmp.eq.f32.partialorder %v1474_v18, 0.0  ;;  %v266_v16 = vsub.f32 %v1434_v55, %v1452_v62  ;;  %v366_v5 = vand.u32 2147483648, %v1477_v19 }
 0x294   : > { %v269_v24 = vand.u32 2147483647, %v1512_v10  ;;  %v333_v57 = vsel %vm331_vm12, %v332_v52, %v330_v27  ;;  %vm382_vm12 = vcmp.gt.f32.partialorder %v1259_v1, 0.001 }
 0x295   : > { %v274_v30 = vand.u32 2147483647, %v266_v16  ;;  %v369_v11 = vsub.f32 %v333_v57, %v1259_v1 }
 0x296   : > { %v284_v38 = vsel %vm276_vm7, %v269_v24, 0.0  ;;  %v392_v24 = vmul.f32 %v979_v31, %v333_v57 }
 0x297   : > { %v371_v31 = vmax.f32 %v369_v11, 0.0 }
 0x299   : > { %626 = vrot.lane.b32.xlu0 %v592_v39, %s1140_s4  ;;  %v1489_v39 = vld [vmem:[%s1247_s24] sm:$0xff] }
 0x29a   : > { %628 = vrot.lane.b32.xlu1 %v593_v42, %s1140_s4  ;;  %v314_v42 = vsub.f32 1.5, %v313_v37  ;;  %v397_v54 = vadd.f32 0.001, %v1489_v39  ;;  %v270_v37 = vand.u32 2147483647, %v262_v17 }
 0x29c   : > { %v315_v9 = vmul.f32 %v971_v20, %v314_v42  ;;  %980 = vrcp.f32 %v397_v54  ;;  %v286_v42 = vadd.f32 %v285_v40, %v284_v38  ;;  %v1562_v52 = vsel %vm276_vm7, %v270_v37, 0.0 }
 0x29d   : > { %982 = vrcp.f32 %v398_v2  ;;  %v362_v2 = vmul.f32 %v361_v53, %v1477_v19  ;;  %v1595_v53 = vsel %vm276_vm7, %v371_v31, 0.0 }
 0x29e   : > { %v316_v60 = vmul.f32 %v315_v9, %v1469_v12  ;;  %v354_v9 = vand.u32 2147483648, %v1474_v18  ;;  %984 = vrcp.f32 %v387_v8 }
 0x2a0   : > { %v318_v20 = vsel %vm317_vm15, %v1469_v12, %v316_v60  ;;  %vm351_vm15 = vcmp.eq.f32.partialorder %v1474_v18, inf  ;;  %v1573_v12 = vsel %vm276_vm7, %v272_v58, 0.0 }
 0x2a1   : > { %699 = vrot.lane.b32.xlu0 %v694_v47, %s1137_s20  ;;  %v1558_v17 = vsel %vm319_vm14, %v320_v22, %v318_v20  ;;  %v394_v20 = vmax.f32 %v392_v24, 0.0 }
 0x2a2   : > { %v981_v36 = vpop.eup %980 }
 0x2a3   : > { %v983_v43 = vpop.eup %982  ;;  %v396_v57 = vmin.f32 %v394_v20, 1.0 }
 0x2a4   : > { %v1582_v37 = vpop.eup %984 }
 0x2cc   : > { %v607_v23 = vpop.permute.xlu2 %606 }
 0x2cd   : > { %v1501_v3 = vsel %vm250_vm2, %v607_v23, 0.0  ;;  %v265_v23 = vsub.f32 %v1419_v50, %v1449_v61  ;;  %v267_v61 = vsub.f32 %v1437_v56, %v1455_v63 }
 0x2cf   : > { %v273_v35 = vand.u32 2147483647, %v265_v23  ;;  %v275_v41 = vand.u32 2147483647, %v267_v61  ;;  %v364_v23 = vsel %vm363_vm13, %v1477_v19, %v362_v2 }
 0x2d0   : > { %v367_v8 = vsel %vm365_vm11, %v366_v5, %v364_v23  ;;  %vm384_vm11 = vcmp.gt.f32.partialorder %v1493_v44, 0.001  ;;  %v1142_v23 = vmov 0.0  }
 0x2d1   : > { %v287_v46 = vsel %vm276_vm7, %v273_v35, 0.0  ;;  %v289_v60 = vsel %vm276_vm7, %v275_v41, 0.0  ;;  %v402_v22 = vmul.f32 %v983_v43, %v367_v8  ;;  %v436_v35 = vand.u32 2147483647, %v1413_v48 }
 0x2d2   : > { %v288_v59 = vadd.f32 %v287_v46, %v286_v42  ;;  %v441_v42 = vand.u32 2147483647, %v1416_v49  ;;  %v442_v46 = vand.u32 2147483647, %v1419_v50  ;;  %vm467_vm13 = vcmp.gt.f32.partialorder %v367_v8, 0.001 }
 0x2d3   : > { %v404_v19 = vmax.f32 %v402_v22, 0.0 }
 0x2d4   : > { %v290_v25 = vadd.f32 %v289_v60, %v288_v59  ;;  %v879_v49 = vadd.f32 -0.001, %v442_v46 }
 0x2d5   : > { %v406_v43 = vmin.f32 %v404_v19, 1.0 }
 0x2d6   : > { %v1587_v16 = vsel %vm276_vm7, %v290_v25, 0.0  ;;  %v446_v60 = vmax.f32 %v879_v49, 0.0 }
 0x2e3   : > { %v619_v47 = vpop.permute.xlu2 %618 }
 0x2e4   : > { %v1505_v4 = vsel %vm249_vm4, %v619_v47, 0.0  ;;  %v352_v47 = vsel %vm351_vm15, %v1474_v18, %v350_v51  ;;  %v1576_v51 = vsel %vm276_vm7, %v274_v30, 0.0  ;;  %v435_v18 = vand.u32 2147483647, %v1410_v7 }
 0x2e5   : > { %v1566_v27 = vsel %vm353_vm0, %v354_v9, %v352_v47  ;;  %v878_v47 = vadd.f32 -0.001, %v441_v42  ;;  %vm737_vm15 = vcmask 1042432   ;;  %vm1751_vm0 = vcmask 1040384  }
 0x2e6   : > { %v876_v41 = vadd.f32 -0.001, %v435_v18  ;;  %vm466_vm14 = vcmp.gt.f32.partialorder %v1566_v27, 0.001 }
 0x2e7   : > { %v445_v59 = vmax.f32 %v878_v47, 0.0 }
 0x2e8   : > { %v439_v48 = vmax.f32 %v876_v41, 0.0 }
 0x2ea   : > { %v447_v2 = vadd.f32 %v445_v59, %v439_v48 }
 0x2eb   : > { %v698_v45 = vpop.permute.xlu2 %697 }
 0x2ec   : > { %v1552_v6 = vsel %vm250_vm2, %v698_v45, 0.0  ;;  %v877_v45 = vadd.f32 -0.001, %v436_v35 }
 0x2ee   : > { %v440_v58 = vmax.f32 %v877_v45, 0.0 }
 0x2f0   : > { %v448_v25 = vadd.f32 %v446_v60, %v440_v58 }
 0x2fb   : > { %v609_v63 = vpop.permute.xlu0 %608 }
 0x2fc   : > { %v599_v54 = vpop.permute.xlu1 %598 }
 0x2fd   : > { %v603_v62 = vsel %vm248_vm1, %v599_v54, 0.0  ;;  %v449_v54 = vand.u32 2147483647, %v1434_v55 }
 0x2fe   : > { %v605_v14 = vadd.f32 %v603_v62, %v1377_v32  ;;  %v613_v32 = vsel %vm250_vm2, %v609_v63, 0.0  ;;  %v401_v63 = vmul.f32 %v981_v36, %v1566_v27 }
 0x2ff   : > { %v880_v55 = vadd.f32 -0.001, %v449_v54 }
 0x300   : > { %v615_v34 = vadd.f32 %v613_v32, %v605_v14  ;;  %v403_v11 = vmax.f32 %v401_v63, 0.0 }
 0x301   : > { %v453_v14 = vmax.f32 %v880_v55, 0.0 }
 0x302   : > { %v625_v36 = vadd.f32 %v1505_v4, %v615_v34  ;;  %v883_v4 = vsel %vm467_vm13, 1.0, %v1142_v23  ;;  %vm745_vm13 = vcmask 1046528  }
 0x303   : > { %v597_v61 = vpop.permute.xlu0 %596  ;;  %v455_v31 = vadd.f32 %v453_v14, %v447_v2 }
 0x304   : > { %v602_v38 = vsel %vm248_vm1, %v597_v61, 0.0  ;;  %v617_v40 = vpop.permute.xlu1 %616  ;;  %vm1606_vm1 = vmand %vm382_vm12, %vm384_vm11  ;;  %v473_v61 = vmul.f32 %v883_v4, %v1512_v10  ;;  %v368_v4 = vsub.f32 %v1558_v17, %v1254_v0  ;;  %vm739_vm12 = vcmask 1043456  }
 0x305   : > { %v604_v7 = vadd.f32 %v602_v38, %v1379_v33  ;;  %v450_v33 = vand.u32 2147483647, %v1437_v56  ;;  %v622_v62 = vsel %vm249_vm4, %v617_v40, 0.0  ;;  %v875_v24 = vsel %vm1606_vm1, 1.0, %v1142_v23 }
 0x306   : > { %vm383_vm4 = vcmp.gt.f32.partialorder %v1489_v39, 0.001  ;;  %v427_v63 = vsel %vm276_vm7, %v875_v24, 0.0  ;;  %v457_v48 = vsel %vm276_vm7, %v455_v31, 0.0  ;;  %vm741_vm11 = vcmask 1044480  }
 0x307   : > { %v614_v9 = vadd.f32 %v1501_v3, %v604_v7  ;;  %v408_v3 = vsub.f32 %v396_v57, %v406_v43  ;;  %v881_v5 = vadd.f32 -0.001, %v450_v33  ;;  %v405_v43 = vmin.f32 %v403_v11, 1.0 }
 0x308   : > { %v882_v33 = vsel %vm466_vm14, 1.0, %v1142_v23  ;;  %v260_v11 = vsub.f32 %v1254_v0, %v1489_v39 }
 0x309   : > { %v624_v56 = vadd.f32 %v622_v62, %v614_v9  ;;  %v454_v32 = vmax.f32 %v881_v5, 0.0  ;;  %v1617_v8 = vmul.f32 %v408_v3, %v408_v3  ;;  %v475_v3 = vmul.f32 %v473_v61, %v1512_v10 }
 0x30a   : > { %v268_v24 = vand.u32 2147483647, %v260_v11 }
 0x30b   : > { %v627_v30 = vpop.permute.xlu0 %626  ;;  %v456_v34 = vadd.f32 %v454_v32, %v448_v25  ;;  %v412_v45 = vsel %vm1606_vm1, %v1617_v8, 0.0  ;;  %v391_v25 = vmul.f32 %v1582_v37, %v1558_v17  ;;  %vm743_vm1 = vcmask 1045504  }
 0x30c   : > { %v632_v44 = vsel %vm251_vm5, %v627_v30, 0.0  ;;  %v629_v1 = vpop.permute.xlu1 %628 }
 0x30d   : > { %v634_v20 = vadd.f32 %v632_v44, %v624_v56  ;;  %v633_v22 = vsel %vm251_vm5, %v629_v1, 0.0  ;;  %v458_v54 = vsel %vm276_vm7, %v456_v34, 0.0  ;;  %vm1745_vm5 = vcmp.lt.s32.totalorder %v1295_v15, 6 }
 0x30e   : > { %v635_v18 = vadd.f32 %v633_v22, %v625_v36  ;;  %v459_v5 = vadd.f32 %v458_v54, %v457_v48  ;;  %v472_v22 = vmul.f32 %v882_v33, %v260_v11  ;;  %v393_v31 = vmax.f32 %v391_v25, 0.0 }
 0x30f   : > { %v636_v19 = vrot.slane %v634_v20, 7  ;;  %v644_v35 = vrot.slane %v634_v20, 1  ;;  %v652_v38 = vrot.slane %v634_v20, 6  ;;  %v660_v40 = vrot.slane %v634_v20, 2 }
 0x310   : > { %v637_v41 = vrot.slane %v635_v18, 7  ;;  %v645_v42 = vrot.slane %v635_v18, 1  ;;  %v653_v7 = vrot.slane %v635_v18, 6  ;;  %v661_v57 = vrot.slane %v635_v18, 2 }
 0x311   : > { %v460_v1 = vrot.slane %v459_v5, 4  ;;  %v477_v34 = vsel %vm276_vm7, %v475_v3, 0.0 }
 0x312   : > { %v638_v46 = vsel %vm542_vm9, %v636_v19, %v637_v41  ;;  %v639_v47 = vsel %vm542_vm9, %v637_v41, %v636_v19  ;;  %v647_v9 = vsel %vm551_vm3, %v645_v42, %v644_v35  ;;  %v655_v36 = vsel %vm560_vm10, %v653_v7, %v652_v38 }
 0x313   : > { %v640_v58 = vsel %vm252_vm8, %v639_v47, 0.0  ;;  %v643_v49 = vadd.f32 %v638_v46, %v635_v18  ;;  %v649_v59 = vsel %vm257_vm6, %v647_v9, 0.0  ;;  %v663_v50 = vsel %vm1745_vm5, %v661_v57, %v660_v40  ;;  %vm1747_vm8 = vmmov %vm1745_vm5 }
 0x314   : > { %v642_v62 = vadd.f32 %v640_v58, %v634_v20  ;;  %v646_v55 = vsel %vm551_vm3, %v644_v35, %v645_v42  ;;  %v654_v2 = vsel %vm560_vm10, %v652_v38, %v653_v7  ;;  %vm1746_vm6 = vcmp.ge.s32.totalorder %v1295_v15, 2 }
 0x315   : > { %v651_v60 = vadd.f32 %v649_v59, %v643_v49  ;;  %v656_v27 = vsel %vm1746_vm6, %v655_v36, 0.0  ;;  %v662_v30 = vsel %vm1747_vm8, %v660_v40, %v661_v57  ;;  %vm1748_vm9 = vcmp.lt.s32.totalorder %v1307_v21, 14  ;;  %v700_v59 = vpop.permute.xlu0 %699 }
 0x316   : > { %v650_v56 = vadd.f32 %v646_v55, %v642_v62  ;;  %v665_v10 = vsel %vm1748_vm9, %v663_v50, 0.0  ;;  %vm381_vm3 = vcmp.gt.f32.partialorder %v1254_v0, 0.001  ;;  %v370_v21 = vmax.f32 %v368_v4, 0.0 }
 0x317   : > { %v659_v14 = vadd.f32 %v654_v2, %v651_v60  ;;  %vm1661_vm10 = vmand %vm381_vm3, %vm383_vm4  ;;  %v277_v0 = vsel %vm276_vm7, %v268_v24, 0.0  ;;  %v395_v35 = vmin.f32 %v393_v31, 1.0  ;;  %v461_v40 = vadd.f32 %v460_v1, %v459_v5 }
 0x318   : > { %v658_v44 = vadd.f32 %v656_v27, %v650_v56  ;;  %v874_v20 = vsel %vm1661_vm10, 1.0, %v1142_v23  ;;  %v279_v61 = vadd.f32 %v1562_v52, %v277_v0  ;;  %v372_v19 = vsel %vm276_vm7, %v370_v21, 0.0 }
 0x319   : > { %v667_v32 = vadd.f32 %v665_v10, %v659_v14  ;;  %v426_v18 = vsel %vm276_vm7, %v874_v20, 0.0  ;;  %v374_v37 = vadd.f32 %v1595_v53, %v372_v19  ;;  %v474_v42 = vmul.f32 %v472_v22, %v260_v11 }
 0x31a   : > { %v666_v8 = vadd.f32 %v662_v30, %v658_v44  ;;  %v428_v38 = vadd.f32 %v427_v63, %v426_v18  ;;  %v281_v41 = vadd.f32 %v1573_v12, %v279_v61  ;;  %v407_v48 = vsub.f32 %v395_v35, %v405_v43 }
 0x31b   : > { %v669_v39 = vmul.f32 0.04, %v667_v32  ;;  %v375_v57 = vrot.slane %v374_v37, 4  ;;  %v414_v52 = vsel %vm276_vm7, %v412_v45, 0.0  ;;  %v476_v53 = vsel %vm276_vm7, %v474_v42, 0.0 }
 0x31c   : > { %v668_v17 = vmul.f32 0.04, %v666_v8  ;;  %v429_v46 = vrot.slane %v428_v38, 4  ;;  %v283_v9 = vadd.f32 %v1576_v51, %v281_v41  ;;  %v409_v58 = vmul.f32 %v407_v48, %v407_v48 }
 0x31d   : > { %v671_v23 = vsub.f32 %v669_v39, %v1369_v28  ;;  %v376_v63 = vadd.f32 %v375_v57, %v374_v37  ;;  %v462_v12 = vrot.slane %v461_v40, 2  ;;  %v478_v33 = vadd.f32 %v477_v34, %v476_v53 }
 0x31e   : > { %v670_v7 = vsub.f32 %v668_v17, %v1371_v29  ;;  %v430_v28 = vadd.f32 %v429_v46, %v428_v38  ;;  %v291_v29 = vsel %vm276_vm7, %v283_v9, 0.0  ;;  %v411_v51 = vsel %vm1661_vm10, %v409_v58, 0.0 }
 0x31f   : > { %v673_v47 = vmul.f32 %v671_v23, %v671_v23  ;;  %v293_v62 = vadd.f32 %v1587_v16, %v291_v29  ;;  %v377_v45 = vrot.slane %v376_v63, 2  ;;  %v413_v50 = vsel %vm276_vm7, %v411_v51, 0.0 }
 0x320   : > { %v672_v54 = vmul.f32 %v670_v7, %v670_v7  ;;  %v431_v3 = vrot.slane %v430_v28, 2  ;;  %v479_v55 = vrot.slane %v478_v33, 4  ;;  %v415_v5 = vadd.f32 %v414_v52, %v413_v50 }
 0x321   : > { %v675_v49 = vsel %vm276_vm7, %v673_v47, 0.0  ;;  %v294_v60 = vrot.slane %v293_v62, 4  ;;  %v378_v2 = vadd.f32 %v377_v45, %v376_v63  ;;  %v704_v56 = vsel %vm250_vm2, %v700_v59, 0.0 }
 0x322   : > { %v674_v43 = vsel %vm276_vm7, %v672_v54, 0.0  ;;  %v705_v27 = vsel %vm276_vm7, %v1552_v6, 0.0  ;;  %v480_v30 = vadd.f32 %v479_v55, %v478_v33  ;;  %v706_v11 = vsel %vm276_vm7, %v704_v56, 0.0 }
 0x323   : > { %v676_v36 = vadd.f32 %v675_v49, %v674_v43  ;;  %v295_v14 = vadd.f32 %v294_v60, %v293_v62  ;;  %v416_v10 = vrot.slane %v415_v5, 4  ;;  %v707_v4 = vadd.f32 %v706_v11, %v705_v27 }
 0x324   : > { %v463_v44 = vadd.f32 %v462_v12, %v461_v40  ;;  %v432_v1 = vadd.f32 %v431_v3, %v430_v28  ;;  %v481_v24 = vrot.slane %v480_v30, 2  ;;  %v379_v32 = vrot.slane %v378_v2, 1 }
 0x325   : > { %v677_v16 = vrot.slane %v676_v36, 4  ;;  %v296_v25 = vrot.slane %v295_v14, 2  ;;  %v417_v21 = vadd.f32 %v416_v10, %v415_v5  ;;  %v708_v20 = vrot.slane %v707_v4, 4 }
 0x326   : > { %v482_v13 = vadd.f32 %v481_v24, %v480_v30  ;;  %v464_v31 = vrot.slane %v463_v44, 1  ;;  %v433_v18 = vrot.slane %v432_v1, 1  ;;  %v380_v61 = vadd.f32 %v379_v32, %v378_v2 }
 0x327   : > { %v678_v15 = vadd.f32 %v677_v16, %v676_v36  ;;  %v297_v8 = vadd.f32 %v296_v25, %v295_v14  ;;  %v418_v0 = vrot.slane %v417_v21, 2  ;;  %v709_v6 = vadd.f32 %v708_v20, %v707_v4 }
 0x328   : > { %v483_v37 = vrot.slane %v482_v13, 1  ;;  %vm735_vm2 = vcmask 1041408   ;;  %v434_v41 = vadd.f32 %v433_v18, %v432_v1  ;;  %v465_v42 = vadd.f32 %v464_v31, %v463_v44 }
 0x329   : > { %v679_v22 = vrot.slane %v678_v15, 2  ;;  %v298_v34 = vrot.slane %v297_v8, 1  ;;  %v419_v19 = vadd.f32 %v418_v0, %v417_v21  ;;  %v710_v17 = vrot.slane %v709_v6, 2 }
 0x32a   : > { %v484_v48 = vadd.f32 %v483_v37, %v482_v13 }
 0x32b   : > { %v680_v39 = vadd.f32 %v679_v22, %v678_v15  ;;  %v299_v35 = vadd.f32 %v298_v34, %v297_v8  ;;  %v420_v38 = vrot.slane %v419_v19, 1  ;;  %v711_v40 = vadd.f32 %v710_v17, %v709_v6 }
 0x32d   : > { %v681_v23 = vrot.slane %v680_v39, 1  ;;  %v421_v7 = vadd.f32 %v420_v38, %v419_v19  ;;  %v734_v57 = vsel %vm1751_vm0, %v299_v35, %v380_v61  ;;  %v712_v46 = vrot.slane %v711_v40, 1 }
 0x32f   : > { %v682_v47 = vadd.f32 %v681_v23, %v680_v39  ;;  %v736_v52 = vsel %vm735_vm2, %v734_v57, %v421_v7  ;;  %v713_v54 = vadd.f32 %v712_v46, %v711_v40 }
 0x330   : > { %v738_v9 = vsel %vm737_vm15, %v736_v52, %v434_v41  ;;  %751 = sbr.rel (%p884_p13) target bundleno = 824 (0x338), region = 40 }
 0x331   : > { %v740_v53 = vsel %vm739_vm12, %v738_v9, %v465_v42 }
 0x332   : > { %v742_v63 = vsel %vm741_vm11, %v740_v53, %v484_v48 }
 0x333   : > { %v744_v58 = vsel %vm743_vm1, %v742_v63, %v682_v47 }
 0x334   : > { %v746_v28 = vsel %vm745_vm13, %v744_v58, %v713_v54 }
 0x335   : > { %v1143_v49 = vmov 0.0  }
 0x336   : > { %752 = vst.msk [vmem:[#allocation7] sm:$0xff] %vm276_vm7, %v1143_v49 }
 0x337   : > { %753 = vst.msk [vmem:[#allocation7 + $0x8] sm:$0xff] %vm276_vm7, %v1143_v49 }
 0x338 PF: > { %p1699_p0 = scmp.eq.s32.totalorder %s862_s15, 1  ;;  %s770_s8 = sshll.u32 %s1735_s2, 4  ;;  %s771_s8 = int_to_ptr.hbm [resolvable:$true] %s770_s8 }
 0x339   : > { %s1144_s9 = smov [#allocation7]   ;;  %s1145_s15 = smov 128  }
 0x33a   : > { %s768_s17 = sshll.u32 %s1144_s9, 4  ;;  %s1146_s18 = smov 8   ;;  %s769_s17 = int_to_ptr.vmem [resolvable:$true] %s768_s17 }
 0x33d   : > { %v754_v12 = vld [vmem:[#allocation7] sm:$0xff] }
 0x33e   : > { %v755_v59 = vld [vmem:[#allocation7 + $0x8] sm:$0xff]  ;;  %v756_v29 = vadd.f32 %v754_v12, %v746_v28 }
 0x33f   : > { %v757_v33 = vadd.f32 %v755_v59, %v1367_v26 }
 0x340   : > { %758 = vst.msk [vmem:[#allocation7] sm:$0xff] %vm276_vm7, %v756_v29 }
 0x341   : > { %759 = vst.msk [vmem:[#allocation7 + $0x8] sm:$0xff] %vm276_vm7, %v757_v33 }
 0x342   : > { %896 = dma.vmem_to_hbm [thread:$0]  (%p1699_p0), %s769_s17, 256, %s771_s8, [#allocation4], %s1145_s15, %s1145_s15, %s1146_s18  }
 0x343   : > { %1107 = dma.done.wait (%p1699_p0), [#allocation4], 256  }
 0x344   : > { %1109 = vsyncadd (%p1699_p0), [#allocation4], 4294967040 }
 0x345 PF: > { %s19_s14 = sadd.s32 1, %s1132_s14   ;;  %s1753_s9 = smov %s1116_s10 }
 0x346   : > { %p16_p1 = scmp.ge.s32.totalorder %s19_s14, 4   ;;  %s1754_s10 = smov %s1120_s11 }
 0x347   : > { %s1755_s11 = smov %s1213_s21  ;;  %s1756_s12 = smov %s1128_s13 }
 0x348   : > { %s1757_s13 = smov %s1759_s16  ;;  %18 = sbr.rel (!%p16_p1) target bundleno = 7 (0x7), region = 83 }
 0x34d   :  { %787 = vsyncpa [#allocation3], 1 }
 0x34e   :  { %789 = vsyncpa [#allocation3 + $0x1], 1 }
 0x34f   :  { %790 = vsyncpa [#allocation6], 1 }
 0x350   :  { %792 = vsyncpa [#allocation6 + $0x1], 1 }
 0x351   :  { %793 = vsyncpa [#allocation4], 1 }
 0x352   :  { %795 = vsyncpa [#allocation4 + $0x1], 1 }

</bundles_post_ra>
